<compile_context>
chip_gen: v7x
topology: tpu7x:2x2x1
jax: 0.10.0
libtpu: 0.0.40
codegen_flags: <defaults>
</compile_context>

<pallas_src>
import functools

import jax
import jax.numpy as jnp
from jax import lax
from jax.experimental import pallas as pl
from jax.experimental.pallas import tpu as pltpu


def _stack_rows(indexed_rows, num_rows):
    """Stack (row_index, (1, C) value) pairs into a (num_rows, C) value.

    Uses broadcasted_iota + jnp.where selects only (pure VPU ops), avoiding
    sub-(8,128)-tile concatenate / reshape relayouts flagged in the review.
    """
    c = indexed_rows[0][1].shape[-1]
    dtype = indexed_rows[0][1].dtype
    row_id = lax.broadcasted_iota(jnp.int32, (num_rows, c), 0)
    out = jnp.zeros((num_rows, c), dtype)
    for r, v in indexed_rows:
        out = jnp.where(row_id == r, v, out)     # (1, C) broadcasts over rows
    return out


def net_fused_kernel(tok_ref, emb_ref, wih_ref, whh_ref, b_ref,
                     wfc_ref, bfc_ref, out_ref, *, batch, seq_len):
    """Fused Embedding -> tanh-RNN -> Linear forward in one invocation.

    tok_ref: (B*T, 1) int32, batch-major flat token ids (row = b*T + t)
    emb_ref: (VS, ED)  embedding table (row 0 is zero: padding_idx=0)
    wih_ref: (ED, HS)  input->hidden weight, pre-transposed
    whh_ref: (HS, HS)  hidden->hidden weight, pre-transposed
    b_ref:   (1, HS)   b_ih + b_hh, pre-summed
    wfc_ref: (HS, VS)  fc weight, pre-transposed
    bfc_ref: (1, VS)   fc bias
    out_ref: (B*T, VS) logits, batch-major flat (row = b*T + t)
    """
    B, T = batch, seq_len
    VS, ED = emb_ref.shape
    HS = whh_ref.shape[0]

    w_hh = whh_ref[...]

    # (1) Fused embedding lookup: one-hot(ids) @ emb on the MXU (VS is tiny).
    #     NB: unlike a clamped gather, an out-of-range id selects a zero row;
    #     ids here are always in [0, VS).
    ids = tok_ref[...]                                               # (B*T, 1)
    onehot = (ids == lax.broadcasted_iota(jnp.int32, (B * T, VS), 1)
              ).astype(jnp.float32)                                  # (B*T, VS)

    # (2) Batched input projection for every timestep at once (off the serial
    #     path).  One-hot selection is exact, so
    #     onehot @ (emb @ W_ih) == (onehot @ emb) @ W_ih  bit-for-bit per row.
    emb_proj = jnp.dot(emb_ref[...], wih_ref[...],
                       preferred_element_type=jnp.float32)           # (VS, HS)
    xp = jnp.dot(onehot, emb_proj,
                 preferred_element_type=jnp.float32) + b_ref[...]    # (B*T, HS)

    # (3) Serial recurrence, fully unrolled (T static & small).  h lives in
    #     vregs; the critical path is one (B,HS)@(HS,HS) matmul + tanh per
    #     step -- the xp_t row picks below do not depend on h and get hoisted.
    h = jnp.zeros((B, HS), jnp.float32)
    h_steps = []
    for t in range(T):
        xp_t = _stack_rows(
            [(b, xp[b * T + t:b * T + t + 1, :]) for b in range(B)], B)
        h = jnp.tanh(xp_t + jnp.dot(h, w_hh,
                                    preferred_element_type=jnp.float32))
        h_steps.append(h)

    # (4) Assemble hidden states batch-major (row = b*T + t) straight from
    #     registers, then one batched FC and a single output store.
    h_all = _stack_rows(
        [(b * T + t, h_steps[t][b:b + 1, :])
         for b in range(B) for t in range(T)], B * T)                # (B*T, HS)
    out_ref[...] = (jnp.dot(h_all, wfc_ref[...],
                            preferred_element_type=jnp.float32)
                    + bfc_ref[...])


def net_forward(token_ids, params):
    """token_ids: (B, T) int32 -> logits (B, T, VS) float32."""
    emb, w_ih, w_hh, b_ih, b_hh, w_fc, b_fc = params
    B, T = token_ids.shape
    VS, ED = emb.shape

    tok_flat = token_ids.reshape(B * T, 1).astype(jnp.int32)  # contiguous, cheap
    b_sum = b_ih + b_hh                                       # fold RNN biases

    # TODO(synk): at LM scale (HS>=512, VS>=10k) pad HS/VS to multiples of 128
    # (lane-dense stores / full MXU width), cast MXU operands to bf16 (keep f32
    # accumulation and tanh), add a "parallel" vocab-tile grid axis for the FC
    # (+ batch tiles for the recurrence) so v7x's second TensorCore is used,
    # and set pltpu.CompilerParams(vmem_limit_bytes=...) for v7x's 64 MiB VMEM.
    # All unnecessary at these toy shapes (everything is a few KB).
    vmem_specs = [pl.BlockSpec(memory_space=pltpu.MemorySpace.VMEM)
                  for _ in range(7)]
    out_flat = pl.pallas_call(
        functools.partial(net_fused_kernel, batch=B, seq_len=T),
        out_shape=jax.ShapeDtypeStruct((B * T, VS), jnp.float32),
        in_specs=vmem_specs,
        out_specs=pl.BlockSpec(memory_space=pltpu.MemorySpace.VMEM),
    )(tok_flat, emb, w_ih, w_hh, b_sum, w_fc, b_fc)

    return out_flat.reshape(B, T, VS)                         # free reshape


def reference_forward(token_ids, params):
    """Pure-JAX reference (lax.scan) for correctness check."""
    emb, w_ih, w_hh, b_ih, b_hh, w_fc, b_fc = params
    x = jnp.take(emb, token_ids, axis=0)                      # (B, T, ED)
    B = x.shape[0]
    HS = w_hh.shape[0]
    h0 = jnp.zeros((B, HS), jnp.float32)

    def step(h, x_t):
        h = jnp.tanh(x_t @ w_ih + h @ w_hh + b_ih[0] + b_hh[0])
        y = h @ w_fc + b_fc[0]
        return h, y

    _, ys = jax.lax.scan(step, h0, jnp.transpose(x, (1, 0, 2)))
    return jnp.transpose(ys, (1, 0, 2))


def make_params(key, VS, ED, HS):
    ks = jax.random.split(key, 7)
    scale = 0.1
    emb = jax.random.normal(ks[0], (VS, ED), jnp.float32) * scale
    emb = emb.at[0].set(0.0)                                  # padding_idx=0
    # Stored pre-transposed as (in_features, out_features).
    w_ih = jax.random.normal(ks[1], (ED, HS), jnp.float32) * scale
    w_hh = jax.random.normal(ks[2], (HS, HS), jnp.float32) * scale
    b_ih = jax.random.normal(ks[3], (1, HS), jnp.float32) * scale
    b_hh = jax.random.normal(ks[4], (1, HS), jnp.float32) * scale
    w_fc = jax.random.normal(ks[5], (HS, VS), jnp.float32) * scale
    b_fc = jax.random.normal(ks[6], (1, VS), jnp.float32) * scale
    return (emb, w_ih, w_hh, b_ih, b_hh, w_fc, b_fc)


if __name__ == "__main__":
    # Small shapes consistent with the module (BS=2, single-layer RNN).
    B, T = 2, 8
    VS, ED, HS = 16, 8, 32

    key = jax.random.PRNGKey(0)
    k_tok, k_par = jax.random.split(key)
    params = make_params(k_par, VS, ED, HS)
    token_ids = jax.random.randint(k_tok, (B, T), 0, VS, dtype=jnp.int32)

    out = jax.jit(net_forward)(token_ids, params)
    out = jax.block_until_ready(out)

    ref = reference_forward(token_ids, params)
    assert out.shape == (B, T, VS)
    assert jnp.allclose(out, ref, atol=1e-4, rtol=1e-4), "mismatch vs reference"

    print("KERNEL_OK")
</pallas_src>

<mosaic_0001>
module attributes {stable_mosaic.version = 11 : i64} {
  func.func @net_fused_kernel(%arg0: memref<16x1xi32, #tpu.memory_space<vmem>>, %arg1: memref<16x8xf32, #tpu.memory_space<vmem>>, %arg2: memref<8x32xf32, #tpu.memory_space<vmem>>, %arg3: memref<32x32xf32, #tpu.memory_space<vmem>>, %arg4: memref<1x32xf32, #tpu.memory_space<vmem>>, %arg5: memref<32x16xf32, #tpu.memory_space<vmem>>, %arg6: memref<1x16xf32, #tpu.memory_space<vmem>>, %arg7: memref<16x16xf32, #tpu.memory_space<vmem>>) attributes {dimension_semantics = [], scalar_prefetch = 0 : i64, scratch_operands = 0 : i64, tpu.core_type = #tpu.core_type<tc>} {
    %c0 = arith.constant 0 : index
    %c0_0 = arith.constant 0 : index
    %0 = vector.load %arg3[%c0, %c0_0] : memref<32x32xf32, #tpu.memory_space<vmem>>, vector<32x32xf32>
    %c0_1 = arith.constant 0 : index
    %c0_2 = arith.constant 0 : index
    %1 = vector.load %arg0[%c0_1, %c0_2] : memref<16x1xi32, #tpu.memory_space<vmem>>, vector<16x1xi32>
    %2 = tpu.iota {dimensions = array<i32: 1>} : vector<16x16xi32>
    %3 = vector.broadcast %1 : vector<16x1xi32> to vector<16x16xi32>
    %4 = arith.cmpi eq, %3, %2 : vector<16x16xi32>
    %5 = arith.extui %4 : vector<16x16xi1> to vector<16x16xi32>
    %6 = arith.sitofp %5 : vector<16x16xi32> to vector<16x16xf32>
    %c0_3 = arith.constant 0 : index
    %c0_4 = arith.constant 0 : index
    %7 = vector.load %arg1[%c0_3, %c0_4] : memref<16x8xf32, #tpu.memory_space<vmem>>, vector<16x8xf32>
    %c0_5 = arith.constant 0 : index
    %c0_6 = arith.constant 0 : index
    %8 = vector.load %arg2[%c0_5, %c0_6] : memref<8x32xf32, #tpu.memory_space<vmem>>, vector<8x32xf32>
    %cst = arith.constant dense<0.000000e+00> : vector<16x32xf32>
    %9 = tpu.matmul %7, %8, %cst {dimension_numbers = #tpu.dot_dimension_numbers<[1], [0], [0], [1], [0, 0, 1, 1], [], []>} : vector<16x8xf32>, vector<8x32xf32>, vector<16x32xf32> -> vector<16x32xf32>
    %cst_7 = arith.constant dense<0.000000e+00> : vector<16x32xf32>
    %10 = tpu.matmul %6, %9, %cst_7 {dimension_numbers = #tpu.dot_dimension_numbers<[1], [0], [0], [1], [0, 0, 1, 1], [], []>} : vector<16x16xf32>, vector<16x32xf32>, vector<16x32xf32> -> vector<16x32xf32>
    %c0_8 = arith.constant 0 : index
    %c0_9 = arith.constant 0 : index
    %11 = vector.load %arg4[%c0_8, %c0_9] : memref<1x32xf32, #tpu.memory_space<vmem>>, vector<1x32xf32>
    %12 = vector.broadcast %11 : vector<1x32xf32> to vector<16x32xf32>
    %13 = arith.addf %10, %12 : vector<16x32xf32>
    %cst_10 = arith.constant 0.000000e+00 : f32
    %14 = vector.broadcast %cst_10 : f32 to vector<2x32xf32>
    %15 = vector.extract_strided_slice %13 {offsets = [0, 0], sizes = [1, 32], strides = [1, 1]} : vector<16x32xf32> to vector<1x32xf32>
    %16 = vector.extract_strided_slice %13 {offsets = [8, 0], sizes = [1, 32], strides = [1, 1]} : vector<16x32xf32> to vector<1x32xf32>
    %17 = tpu.iota {dimensions = array<i32: 0>} : vector<2x32xi32>
    %cst_11 = arith.constant 0.000000e+00 : f32
    %18 = vector.broadcast %cst_11 : f32 to vector<2x32xf32>
    %c0_i32 = arith.constant 0 : i32
    %19 = vector.broadcast %c0_i32 : i32 to vector<2x32xi32>
    %20 = arith.cmpi eq, %17, %19 : vector<2x32xi32>
    %21 = vector.shape_cast %15 : vector<1x32xf32> to vector<1x32xf32>
    %22 = vector.broadcast %21 : vector<1x32xf32> to vector<2x32xf32>
    %23 = arith.select %20, %22, %18 : vector<2x32xi1>, vector<2x32xf32>
    %c1_i32 = arith.constant 1 : i32
    %24 = vector.broadcast %c1_i32 : i32 to vector<2x32xi32>
    %25 = arith.cmpi eq, %17, %24 : vector<2x32xi32>
    %26 = vector.shape_cast %16 : vector<1x32xf32> to vector<1x32xf32>
    %27 = vector.broadcast %26 : vector<1x32xf32> to vector<2x32xf32>
    %28 = arith.select %25, %27, %23 : vector<2x32xi1>, vector<2x32xf32>
    %cst_12 = arith.constant dense<0.000000e+00> : vector<2x32xf32>
    %29 = tpu.matmul %14, %0, %cst_12 {dimension_numbers = #tpu.dot_dimension_numbers<[1], [0], [0], [1], [0, 0, 1, 1], [], []>} : vector<2x32xf32>, vector<32x32xf32>, vector<2x32xf32> -> vector<2x32xf32>
    %30 = arith.addf %28, %29 : vector<2x32xf32>
    %31 = math.tanh %30 : vector<2x32xf32>
    %32 = vector.extract_strided_slice %13 {offsets = [1, 0], sizes = [1, 32], strides = [1, 1]} : vector<16x32xf32> to vector<1x32xf32>
    %33 = vector.extract_strided_slice %13 {offsets = [9, 0], sizes = [1, 32], strides = [1, 1]} : vector<16x32xf32> to vector<1x32xf32>
    %34 = tpu.iota {dimensions = array<i32: 0>} : vector<2x32xi32>
    %cst_13 = arith.constant 0.000000e+00 : f32
    %35 = vector.broadcast %cst_13 : f32 to vector<2x32xf32>
    %c0_i32_14 = arith.constant 0 : i32
    %36 = vector.broadcast %c0_i32_14 : i32 to vector<2x32xi32>
    %37 = arith.cmpi eq, %34, %36 : vector<2x32xi32>
    %38 = vector.shape_cast %32 : vector<1x32xf32> to vector<1x32xf32>
    %39 = vector.broadcast %38 : vector<1x32xf32> to vector<2x32xf32>
    %40 = arith.select %37, %39, %35 : vector<2x32xi1>, vector<2x32xf32>
    %c1_i32_15 = arith.constant 1 : i32
    %41 = vector.broadcast %c1_i32_15 : i32 to vector<2x32xi32>
    %42 = arith.cmpi eq, %34, %41 : vector<2x32xi32>
    %43 = vector.shape_cast %33 : vector<1x32xf32> to vector<1x32xf32>
    %44 = vector.broadcast %43 : vector<1x32xf32> to vector<2x32xf32>
    %45 = arith.select %42, %44, %40 : vector<2x32xi1>, vector<2x32xf32>
    %cst_16 = arith.constant dense<0.000000e+00> : vector<2x32xf32>
    %46 = tpu.matmul %31, %0, %cst_16 {dimension_numbers = #tpu.dot_dimension_numbers<[1], [0], [0], [1], [0, 0, 1, 1], [], []>} : vector<2x32xf32>, vector<32x32xf32>, vector<2x32xf32> -> vector<2x32xf32>
    %47 = arith.addf %45, %46 : vector<2x32xf32>
    %48 = math.tanh %47 : vector<2x32xf32>
    %49 = vector.extract_strided_slice %13 {offsets = [2, 0], sizes = [1, 32], strides = [1, 1]} : vector<16x32xf32> to vector<1x32xf32>
    %50 = vector.extract_strided_slice %13 {offsets = [10, 0], sizes = [1, 32], strides = [1, 1]} : vector<16x32xf32> to vector<1x32xf32>
    %51 = tpu.iota {dimensions = array<i32: 0>} : vector<2x32xi32>
    %cst_17 = arith.constant 0.000000e+00 : f32
    %52 = vector.broadcast %cst_17 : f32 to vector<2x32xf32>
    %c0_i32_18 = arith.constant 0 : i32
    %53 = vector.broadcast %c0_i32_18 : i32 to vector<2x32xi32>
    %54 = arith.cmpi eq, %51, %53 : vector<2x32xi32>
    %55 = vector.shape_cast %49 : vector<1x32xf32> to vector<1x32xf32>
    %56 = vector.broadcast %55 : vector<1x32xf32> to vector<2x32xf32>
    %57 = arith.select %54, %56, %52 : vector<2x32xi1>, vector<2x32xf32>
    %c1_i32_19 = arith.constant 1 : i32
    %58 = vector.broadcast %c1_i32_19 : i32 to vector<2x32xi32>
    %59 = arith.cmpi eq, %51, %58 : vector<2x32xi32>
    %60 = vector.shape_cast %50 : vector<1x32xf32> to vector<1x32xf32>
    %61 = vector.broadcast %60 : vector<1x32xf32> to vector<2x32xf32>
    %62 = arith.select %59, %61, %57 : vector<2x32xi1>, vector<2x32xf32>
    %cst_20 = arith.constant dense<0.000000e+00> : vector<2x32xf32>
    %63 = tpu.matmul %48, %0, %cst_20 {dimension_numbers = #tpu.dot_dimension_numbers<[1], [0], [0], [1], [0, 0, 1, 1], [], []>} : vector<2x32xf32>, vector<32x32xf32>, vector<2x32xf32> -> vector<2x32xf32>
    %64 = arith.addf %62, %63 : vector<2x32xf32>
    %65 = math.tanh %64 : vector<2x32xf32>
    %66 = vector.extract_strided_slice %13 {offsets = [3, 0], sizes = [1, 32], strides = [1, 1]} : vector<16x32xf32> to vector<1x32xf32>
    %67 = vector.extract_strided_slice %13 {offsets = [11, 0], sizes = [1, 32], strides = [1, 1]} : vector<16x32xf32> to vector<1x32xf32>
    %68 = tpu.iota {dimensions = array<i32: 0>} : vector<2x32xi32>
    %cst_21 = arith.constant 0.000000e+00 : f32
    %69 = vector.broadcast %cst_21 : f32 to vector<2x32xf32>
    %c0_i32_22 = arith.constant 0 : i32
    %70 = vector.broadcast %c0_i32_22 : i32 to vector<2x32xi32>
    %71 = arith.cmpi eq, %68, %70 : vector<2x32xi32>
    %72 = vector.shape_cast %66 : vector<1x32xf32> to vector<1x32xf32>
    %73 = vector.broadcast %72 : vector<1x32xf32> to vector<2x32xf32>
    %74 = arith.select %71, %73, %69 : vector<2x32xi1>, vector<2x32xf32>
    %c1_i32_23 = arith.constant 1 : i32
    %75 = vector.broadcast %c1_i32_23 : i32 to vector<2x32xi32>
    %76 = arith.cmpi eq, %68, %75 : vector<2x32xi32>
    %77 = vector.shape_cast %67 : vector<1x32xf32> to vector<1x32xf32>
    %78 = vector.broadcast %77 : vector<1x32xf32> to vector<2x32xf32>
    %79 = arith.select %76, %78, %74 : vector<2x32xi1>, vector<2x32xf32>
    %cst_24 = arith.constant dense<0.000000e+00> : vector<2x32xf32>
    %80 = tpu.matmul %65, %0, %cst_24 {dimension_numbers = #tpu.dot_dimension_numbers<[1], [0], [0], [1], [0, 0, 1, 1], [], []>} : vector<2x32xf32>, vector<32x32xf32>, vector<2x32xf32> -> vector<2x32xf32>
    %81 = arith.addf %79, %80 : vector<2x32xf32>
    %82 = math.tanh %81 : vector<2x32xf32>
    %83 = vector.extract_strided_slice %13 {offsets = [4, 0], sizes = [1, 32], strides = [1, 1]} : vector<16x32xf32> to vector<1x32xf32>
    %84 = vector.extract_strided_slice %13 {offsets = [12, 0], sizes = [1, 32], strides = [1, 1]} : vector<16x32xf32> to vector<1x32xf32>
    %85 = tpu.iota {dimensions = array<i32: 0>} : vector<2x32xi32>
    %cst_25 = arith.constant 0.000000e+00 : f32
    %86 = vector.broadcast %cst_25 : f32 to vector<2x32xf32>
    %c0_i32_26 = arith.constant 0 : i32
    %87 = vector.broadcast %c0_i32_26 : i32 to vector<2x32xi32>
    %88 = arith.cmpi eq, %85, %87 : vector<2x32xi32>
    %89 = vector.shape_cast %83 : vector<1x32xf32> to vector<1x32xf32>
    %90 = vector.broadcast %89 : vector<1x32xf32> to vector<2x32xf32>
    %91 = arith.select %88, %90, %86 : vector<2x32xi1>, vector<2x32xf32>
    %c1_i32_27 = arith.constant 1 : i32
    %92 = vector.broadcast %c1_i32_27 : i32 to vector<2x32xi32>
    %93 = arith.cmpi eq, %85, %92 : vector<2x32xi32>
    %94 = vector.shape_cast %84 : vector<1x32xf32> to vector<1x32xf32>
    %95 = vector.broadcast %94 : vector<1x32xf32> to vector<2x32xf32>
    %96 = arith.select %93, %95, %91 : vector<2x32xi1>, vector<2x32xf32>
    %cst_28 = arith.constant dense<0.000000e+00> : vector<2x32xf32>
    %97 = tpu.matmul %82, %0, %cst_28 {dimension_numbers = #tpu.dot_dimension_numbers<[1], [0], [0], [1], [0, 0, 1, 1], [], []>} : vector<2x32xf32>, vector<32x32xf32>, vector<2x32xf32> -> vector<2x32xf32>
    %98 = arith.addf %96, %97 : vector<2x32xf32>
    %99 = math.tanh %98 : vector<2x32xf32>
    %100 = vector.extract_strided_slice %13 {offsets = [5, 0], sizes = [1, 32], strides = [1, 1]} : vector<16x32xf32> to vector<1x32xf32>
    %101 = vector.extract_strided_slice %13 {offsets = [13, 0], sizes = [1, 32], strides = [1, 1]} : vector<16x32xf32> to vector<1x32xf32>
    %102 = tpu.iota {dimensions = array<i32: 0>} : vector<2x32xi32>
    %cst_29 = arith.constant 0.000000e+00 : f32
    %103 = vector.broadcast %cst_29 : f32 to vector<2x32xf32>
    %c0_i32_30 = arith.constant 0 : i32
    %104 = vector.broadcast %c0_i32_30 : i32 to vector<2x32xi32>
    %105 = arith.cmpi eq, %102, %104 : vector<2x32xi32>
    %106 = vector.shape_cast %100 : vector<1x32xf32> to vector<1x32xf32>
    %107 = vector.broadcast %106 : vector<1x32xf32> to vector<2x32xf32>
    %108 = arith.select %105, %107, %103 : vector<2x32xi1>, vector<2x32xf32>
    %c1_i32_31 = arith.constant 1 : i32
    %109 = vector.broadcast %c1_i32_31 : i32 to vector<2x32xi32>
    %110 = arith.cmpi eq, %102, %109 : vector<2x32xi32>
    %111 = vector.shape_cast %101 : vector<1x32xf32> to vector<1x32xf32>
    %112 = vector.broadcast %111 : vector<1x32xf32> to vector<2x32xf32>
    %113 = arith.select %110, %112, %108 : vector<2x32xi1>, vector<2x32xf32>
    %cst_32 = arith.constant dense<0.000000e+00> : vector<2x32xf32>
    %114 = tpu.matmul %99, %0, %cst_32 {dimension_numbers = #tpu.dot_dimension_numbers<[1], [0], [0], [1], [0, 0, 1, 1], [], []>} : vector<2x32xf32>, vector<32x32xf32>, vector<2x32xf32> -> vector<2x32xf32>
    %115 = arith.addf %113, %114 : vector<2x32xf32>
    %116 = math.tanh %115 : vector<2x32xf32>
    %117 = vector.extract_strided_slice %13 {offsets = [6, 0], sizes = [1, 32], strides = [1, 1]} : vector<16x32xf32> to vector<1x32xf32>
    %118 = vector.extract_strided_slice %13 {offsets = [14, 0], sizes = [1, 32], strides = [1, 1]} : vector<16x32xf32> to vector<1x32xf32>
    %119 = tpu.iota {dimensions = array<i32: 0>} : vector<2x32xi32>
    %cst_33 = arith.constant 0.000000e+00 : f32
    %120 = vector.broadcast %cst_33 : f32 to vector<2x32xf32>
    %c0_i32_34 = arith.constant 0 : i32
    %121 = vector.broadcast %c0_i32_34 : i32 to vector<2x32xi32>
    %122 = arith.cmpi eq, %119, %121 : vector<2x32xi32>
    %123 = vector.shape_cast %117 : vector<1x32xf32> to vector<1x32xf32>
    %124 = vector.broadcast %123 : vector<1x32xf32> to vector<2x32xf32>
    %125 = arith.select %122, %124, %120 : vector<2x32xi1>, vector<2x32xf32>
    %c1_i32_35 = arith.constant 1 : i32
    %126 = vector.broadcast %c1_i32_35 : i32 to vector<2x32xi32>
    %127 = arith.cmpi eq, %119, %126 : vector<2x32xi32>
    %128 = vector.shape_cast %118 : vector<1x32xf32> to vector<1x32xf32>
    %129 = vector.broadcast %128 : vector<1x32xf32> to vector<2x32xf32>
    %130 = arith.select %127, %129, %125 : vector<2x32xi1>, vector<2x32xf32>
    %cst_36 = arith.constant dense<0.000000e+00> : vector<2x32xf32>
    %131 = tpu.matmul %116, %0, %cst_36 {dimension_numbers = #tpu.dot_dimension_numbers<[1], [0], [0], [1], [0, 0, 1, 1], [], []>} : vector<2x32xf32>, vector<32x32xf32>, vector<2x32xf32> -> vector<2x32xf32>
    %132 = arith.addf %130, %131 : vector<2x32xf32>
    %133 = math.tanh %132 : vector<2x32xf32>
    %134 = vector.extract_strided_slice %13 {offsets = [7, 0], sizes = [1, 32], strides = [1, 1]} : vector<16x32xf32> to vector<1x32xf32>
    %135 = vector.extract_strided_slice %13 {offsets = [15, 0], sizes = [1, 32], strides = [1, 1]} : vector<16x32xf32> to vector<1x32xf32>
    %136 = tpu.iota {dimensions = array<i32: 0>} : vector<2x32xi32>
    %cst_37 = arith.constant 0.000000e+00 : f32
    %137 = vector.broadcast %cst_37 : f32 to vector<2x32xf32>
    %c0_i32_38 = arith.constant 0 : i32
    %138 = vector.broadcast %c0_i32_38 : i32 to vector<2x32xi32>
    %139 = arith.cmpi eq, %136, %138 : vector<2x32xi32>
    %140 = vector.shape_cast %134 : vector<1x32xf32> to vector<1x32xf32>
    %141 = vector.broadcast %140 : vector<1x32xf32> to vector<2x32xf32>
    %142 = arith.select %139, %141, %137 : vector<2x32xi1>, vector<2x32xf32>
    %c1_i32_39 = arith.constant 1 : i32
    %143 = vector.broadcast %c1_i32_39 : i32 to vector<2x32xi32>
    %144 = arith.cmpi eq, %136, %143 : vector<2x32xi32>
    %145 = vector.shape_cast %135 : vector<1x32xf32> to vector<1x32xf32>
    %146 = vector.broadcast %145 : vector<1x32xf32> to vector<2x32xf32>
    %147 = arith.select %144, %146, %142 : vector<2x32xi1>, vector<2x32xf32>
    %cst_40 = arith.constant dense<0.000000e+00> : vector<2x32xf32>
    %148 = tpu.matmul %133, %0, %cst_40 {dimension_numbers = #tpu.dot_dimension_numbers<[1], [0], [0], [1], [0, 0, 1, 1], [], []>} : vector<2x32xf32>, vector<32x32xf32>, vector<2x32xf32> -> vector<2x32xf32>
    %149 = arith.addf %147, %148 : vector<2x32xf32>
    %150 = math.tanh %149 : vector<2x32xf32>
    %151 = vector.extract_strided_slice %31 {offsets = [0, 0], sizes = [1, 32], strides = [1, 1]} : vector<2x32xf32> to vector<1x32xf32>
    %152 = vector.extract_strided_slice %48 {offsets = [0, 0], sizes = [1, 32], strides = [1, 1]} : vector<2x32xf32> to vector<1x32xf32>
    %153 = vector.extract_strided_slice %65 {offsets = [0, 0], sizes = [1, 32], strides = [1, 1]} : vector<2x32xf32> to vector<1x32xf32>
    %154 = vector.extract_strided_slice %82 {offsets = [0, 0], sizes = [1, 32], strides = [1, 1]} : vector<2x32xf32> to vector<1x32xf32>
    %155 = vector.extract_strided_slice %99 {offsets = [0, 0], sizes = [1, 32], strides = [1, 1]} : vector<2x32xf32> to vector<1x32xf32>
    %156 = vector.extract_strided_slice %116 {offsets = [0, 0], sizes = [1, 32], strides = [1, 1]} : vector<2x32xf32> to vector<1x32xf32>
    %157 = vector.extract_strided_slice %133 {offsets = [0, 0], sizes = [1, 32], strides = [1, 1]} : vector<2x32xf32> to vector<1x32xf32>
    %158 = vector.extract_strided_slice %150 {offsets = [0, 0], sizes = [1, 32], strides = [1, 1]} : vector<2x32xf32> to vector<1x32xf32>
    %159 = vector.extract_strided_slice %31 {offsets = [1, 0], sizes = [1, 32], strides = [1, 1]} : vector<2x32xf32> to vector<1x32xf32>
    %160 = vector.extract_strided_slice %48 {offsets = [1, 0], sizes = [1, 32], strides = [1, 1]} : vector<2x32xf32> to vector<1x32xf32>
    %161 = vector.extract_strided_slice %65 {offsets = [1, 0], sizes = [1, 32], strides = [1, 1]} : vector<2x32xf32> to vector<1x32xf32>
    %162 = vector.extract_strided_slice %82 {offsets = [1, 0], sizes = [1, 32], strides = [1, 1]} : vector<2x32xf32> to vector<1x32xf32>
    %163 = vector.extract_strided_slice %99 {offsets = [1, 0], sizes = [1, 32], strides = [1, 1]} : vector<2x32xf32> to vector<1x32xf32>
    %164 = vector.extract_strided_slice %116 {offsets = [1, 0], sizes = [1, 32], strides = [1, 1]} : vector<2x32xf32> to vector<1x32xf32>
    %165 = vector.extract_strided_slice %133 {offsets = [1, 0], sizes = [1, 32], strides = [1, 1]} : vector<2x32xf32> to vector<1x32xf32>
    %166 = vector.extract_strided_slice %150 {offsets = [1, 0], sizes = [1, 32], strides = [1, 1]} : vector<2x32xf32> to vector<1x32xf32>
    %167 = tpu.iota {dimensions = array<i32: 0>} : vector<16x32xi32>
    %cst_41 = arith.constant 0.000000e+00 : f32
    %168 = vector.broadcast %cst_41 : f32 to vector<16x32xf32>
    %c0_i32_42 = arith.constant 0 : i32
    %169 = vector.broadcast %c0_i32_42 : i32 to vector<16x32xi32>
    %170 = arith.cmpi eq, %167, %169 : vector<16x32xi32>
    %171 = vector.shape_cast %151 : vector<1x32xf32> to vector<1x32xf32>
    %172 = vector.broadcast %171 : vector<1x32xf32> to vector<16x32xf32>
    %173 = arith.select %170, %172, %168 : vector<16x32xi1>, vector<16x32xf32>
    %c1_i32_43 = arith.constant 1 : i32
    %174 = vector.broadcast %c1_i32_43 : i32 to vector<16x32xi32>
    %175 = arith.cmpi eq, %167, %174 : vector<16x32xi32>
    %176 = vector.shape_cast %152 : vector<1x32xf32> to vector<1x32xf32>
    %177 = vector.broadcast %176 : vector<1x32xf32> to vector<16x32xf32>
    %178 = arith.select %175, %177, %173 : vector<16x32xi1>, vector<16x32xf32>
    %c2_i32 = arith.constant 2 : i32
    %179 = vector.broadcast %c2_i32 : i32 to vector<16x32xi32>
    %180 = arith.cmpi eq, %167, %179 : vector<16x32xi32>
    %181 = vector.shape_cast %153 : vector<1x32xf32> to vector<1x32xf32>
    %182 = vector.broadcast %181 : vector<1x32xf32> to vector<16x32xf32>
    %183 = arith.select %180, %182, %178 : vector<16x32xi1>, vector<16x32xf32>
    %c3_i32 = arith.constant 3 : i32
    %184 = vector.broadcast %c3_i32 : i32 to vector<16x32xi32>
    %185 = arith.cmpi eq, %167, %184 : vector<16x32xi32>
    %186 = vector.shape_cast %154 : vector<1x32xf32> to vector<1x32xf32>
    %187 = vector.broadcast %186 : vector<1x32xf32> to vector<16x32xf32>
    %188 = arith.select %185, %187, %183 : vector<16x32xi1>, vector<16x32xf32>
    %c4_i32 = arith.constant 4 : i32
    %189 = vector.broadcast %c4_i32 : i32 to vector<16x32xi32>
    %190 = arith.cmpi eq, %167, %189 : vector<16x32xi32>
    %191 = vector.shape_cast %155 : vector<1x32xf32> to vector<1x32xf32>
    %192 = vector.broadcast %191 : vector<1x32xf32> to vector<16x32xf32>
    %193 = arith.select %190, %192, %188 : vector<16x32xi1>, vector<16x32xf32>
    %c5_i32 = arith.constant 5 : i32
    %194 = vector.broadcast %c5_i32 : i32 to vector<16x32xi32>
    %195 = arith.cmpi eq, %167, %194 : vector<16x32xi32>
    %196 = vector.shape_cast %156 : vector<1x32xf32> to vector<1x32xf32>
    %197 = vector.broadcast %196 : vector<1x32xf32> to vector<16x32xf32>
    %198 = arith.select %195, %197, %193 : vector<16x32xi1>, vector<16x32xf32>
    %c6_i32 = arith.constant 6 : i32
    %199 = vector.broadcast %c6_i32 : i32 to vector<16x32xi32>
    %200 = arith.cmpi eq, %167, %199 : vector<16x32xi32>
    %201 = vector.shape_cast %157 : vector<1x32xf32> to vector<1x32xf32>
    %202 = vector.broadcast %201 : vector<1x32xf32> to vector<16x32xf32>
    %203 = arith.select %200, %202, %198 : vector<16x32xi1>, vector<16x32xf32>
    %c7_i32 = arith.constant 7 : i32
    %204 = vector.broadcast %c7_i32 : i32 to vector<16x32xi32>
    %205 = arith.cmpi eq, %167, %204 : vector<16x32xi32>
    %206 = vector.shape_cast %158 : vector<1x32xf32> to vector<1x32xf32>
    %207 = vector.broadcast %206 : vector<1x32xf32> to vector<16x32xf32>
    %208 = arith.select %205, %207, %203 : vector<16x32xi1>, vector<16x32xf32>
    %c8_i32 = arith.constant 8 : i32
    %209 = vector.broadcast %c8_i32 : i32 to vector<16x32xi32>
    %210 = arith.cmpi eq, %167, %209 : vector<16x32xi32>
    %211 = vector.shape_cast %159 : vector<1x32xf32> to vector<1x32xf32>
    %212 = vector.broadcast %211 : vector<1x32xf32> to vector<16x32xf32>
    %213 = arith.select %210, %212, %208 : vector<16x32xi1>, vector<16x32xf32>
    %c9_i32 = arith.constant 9 : i32
    %214 = vector.broadcast %c9_i32 : i32 to vector<16x32xi32>
    %215 = arith.cmpi eq, %167, %214 : vector<16x32xi32>
    %216 = vector.shape_cast %160 : vector<1x32xf32> to vector<1x32xf32>
    %217 = vector.broadcast %216 : vector<1x32xf32> to vector<16x32xf32>
    %218 = arith.select %215, %217, %213 : vector<16x32xi1>, vector<16x32xf32>
    %c10_i32 = arith.constant 10 : i32
    %219 = vector.broadcast %c10_i32 : i32 to vector<16x32xi32>
    %220 = arith.cmpi eq, %167, %219 : vector<16x32xi32>
    %221 = vector.shape_cast %161 : vector<1x32xf32> to vector<1x32xf32>
    %222 = vector.broadcast %221 : vector<1x32xf32> to vector<16x32xf32>
    %223 = arith.select %220, %222, %218 : vector<16x32xi1>, vector<16x32xf32>
    %c11_i32 = arith.constant 11 : i32
    %224 = vector.broadcast %c11_i32 : i32 to vector<16x32xi32>
    %225 = arith.cmpi eq, %167, %224 : vector<16x32xi32>
    %226 = vector.shape_cast %162 : vector<1x32xf32> to vector<1x32xf32>
    %227 = vector.broadcast %226 : vector<1x32xf32> to vector<16x32xf32>
    %228 = arith.select %225, %227, %223 : vector<16x32xi1>, vector<16x32xf32>
    %c12_i32 = arith.constant 12 : i32
    %229 = vector.broadcast %c12_i32 : i32 to vector<16x32xi32>
    %230 = arith.cmpi eq, %167, %229 : vector<16x32xi32>
    %231 = vector.shape_cast %163 : vector<1x32xf32> to vector<1x32xf32>
    %232 = vector.broadcast %231 : vector<1x32xf32> to vector<16x32xf32>
    %233 = arith.select %230, %232, %228 : vector<16x32xi1>, vector<16x32xf32>
    %c13_i32 = arith.constant 13 : i32
    %234 = vector.broadcast %c13_i32 : i32 to vector<16x32xi32>
    %235 = arith.cmpi eq, %167, %234 : vector<16x32xi32>
    %236 = vector.shape_cast %164 : vector<1x32xf32> to vector<1x32xf32>
    %237 = vector.broadcast %236 : vector<1x32xf32> to vector<16x32xf32>
    %238 = arith.select %235, %237, %233 : vector<16x32xi1>, vector<16x32xf32>
    %c14_i32 = arith.constant 14 : i32
    %239 = vector.broadcast %c14_i32 : i32 to vector<16x32xi32>
    %240 = arith.cmpi eq, %167, %239 : vector<16x32xi32>
    %241 = vector.shape_cast %165 : vector<1x32xf32> to vector<1x32xf32>
    %242 = vector.broadcast %241 : vector<1x32xf32> to vector<16x32xf32>
    %243 = arith.select %240, %242, %238 : vector<16x32xi1>, vector<16x32xf32>
    %c15_i32 = arith.constant 15 : i32
    %244 = vector.broadcast %c15_i32 : i32 to vector<16x32xi32>
    %245 = arith.cmpi eq, %167, %244 : vector<16x32xi32>
    %246 = vector.shape_cast %166 : vector<1x32xf32> to vector<1x32xf32>
    %247 = vector.broadcast %246 : vector<1x32xf32> to vector<16x32xf32>
    %248 = arith.select %245, %247, %243 : vector<16x32xi1>, vector<16x32xf32>
    %c0_44 = arith.constant 0 : index
    %c0_45 = arith.constant 0 : index
    %249 = vector.load %arg5[%c0_44, %c0_45] : memref<32x16xf32, #tpu.memory_space<vmem>>, vector<32x16xf32>
    %cst_46 = arith.constant dense<0.000000e+00> : vector<16x16xf32>
    %250 = tpu.matmul %248, %249, %cst_46 {dimension_numbers = #tpu.dot_dimension_numbers<[1], [0], [0], [1], [0, 0, 1, 1], [], []>} : vector<16x32xf32>, vector<32x16xf32>, vector<16x16xf32> -> vector<16x16xf32>
    %c0_47 = arith.constant 0 : index
    %c0_48 = arith.constant 0 : index
    %251 = vector.load %arg6[%c0_47, %c0_48] : memref<1x16xf32, #tpu.memory_space<vmem>>, vector<1x16xf32>
    %252 = vector.broadcast %251 : vector<1x16xf32> to vector<16x16xf32>
    %253 = arith.addf %250, %252 : vector<16x16xf32>
    %c0_49 = arith.constant 0 : index
    %c0_50 = arith.constant 0 : index
    %254 = vector.load %arg7[%c0_49, %c0_50] : memref<16x16xf32, #tpu.memory_space<vmem>>, vector<16x16xf32>
    tpu.vector_store %arg7[%c0_49, %c0_50], %253 {strides = array<i32>} : memref<16x16xf32, #tpu.memory_space<vmem>>, vector<16x16xf32>,
    return
  }
}

</mosaic_0001>

<bundles_post_ra>
// kernel: net_forward.1
= control target key start
LH: loop header
LB: loop body
LE: loop exit
PB: predicated region body
PF: predicated region fallthrough
CT: control target
= control target key end

     0   :  { %vm50_vm0 = vcmask 64512   ;;  %s1708_s0 = inlined_call_operand.vmem [shape: s32[16,1], index: 0, kind: input, shape index: {}]   ;;  %s1709_s1 = inlined_call_operand.vmem [shape: f32[16,8], index: 1, kind: input, shape index: {}]   ;;  %s1710_s2 = inlined_call_operand.vmem [shape: f32[8,32], index: 2, kind: input, shape index: {}]   ;;  %s1711_s3 = inlined_call_operand.vmem [shape: f32[32,32], index: 3, kind: input, shape index: {}]   ;;  %s1712_s4 = inlined_call_operand.vmem [shape: f32[1,32], index: 4, kind: input, shape index: {}]   ;;  %s1713_s5 = inlined_call_operand.vmem [shape: f32[32,16], index: 5, kind: input, shape index: {}]   ;;  %s1714_s6 = inlined_call_operand.vmem [shape: f32[1,16], index: 6, kind: input, shape index: {}]   ;;  %s1715_s7 = inlined_call_operand.hbm [shape: f32[16,16], index: 7, kind: output, shape index: {}]  }
   0x1   :  { %v49_v0 = vld [vmem:[%s1710_s2] sm:$0xff]  ;;  %v48_v2 = vld [vmem:[%s1709_s1 + $0x8] sm:$0xff] }
   0x2   :  { %v47_v1 = vld [vmem:[%s1709_s1] sm:$0xff]  ;;  %1213 = vmatprep.subr.mxu1 %v49_v0 }
   0x3   :  { %1215 = vmatprep.mubr.msk.f32.mxu1 %vm50_vm0, %v47_v1  ;;  %v31_v3 = vld [vmem:[%s1708_s0] sm:$0xff] }
   0x4   :  { %12 = vsyncpa [#allocation3], 0  ;;  %1214 = vmatpush3.msra.mxu1 %v49_v0  ;;  %v1432_v4 = vmov 0   ;;  %v32_v5 = vld [vmem:[%s1708_s0 + $0x8] sm:$0xff]  ;;  %v27_v6 = vld [vmem:[%s1711_s3] sm:$0xff]  ;;  %v1433_v9 = vmov 0.0|0.0   ;;  %v33_v14 = vlaneseq }
   0x5   :  { %1391 = vset.pattern.permute.xlu0 %v1432_v4  ;;  %1216 = vmatmul.mubr.msk.f32.vlgmr.msra.gmra.mrb[0].mxu1 %vm50_vm0, %v48_v2  ;;  %v28_v7 = vld [vmem:[%s1711_s3 + $0x8] sm:$0xff]  ;;  %v29_v10 = vld [vmem:[%s1711_s3 + $0x10] sm:$0xff]  ;;  %v30_v11 = vld [vmem:[%s1711_s3 + $0x18] sm:$0xff]  ;;  %vm1434_vm1 = vmmov 0   ;;  %v1435_v13 = vmov 0.0   ;;  %vm139_vm2 = vcmask 130048  }
   0x6   :  { %36 = vperm.xlu0 %1391, %v31_v3   ;;  %v1500_v8 = vpack.c.bf16 %v28_v7, %v27_v6  ;;  %1328 = vmatprep.subr.bf16.mxu0 %v1433_v9  ;;  %v1511_v12 = vpack.c.bf16 %v30_v11, %v29_v10  ;;  %v34_v15 = vand.u32 127, %v33_v14  ;;  %v1535_v25 = vshrl.u32 %v33_v14, 7  ;;  %v1147_v26 = vld [vmem:[%s1712_s4] ss:$0 sm:$0xff]  ;;  %s1436_s25 = smov [#allocation2]  }
   0x7   :  { %1233 = vmatprep.mubr.msk.f32.mxu0 %vm1434_vm1, %v1435_v13  ;;  %vm235_vm7 = vcmask 261120   ;;  %s1132_s26 = sshll.u32 %s1436_s25, 4  ;;  %s1133_s26 = int_to_ptr.vmem [resolvable:$true] %s1132_s26 }
   0x8   :  { %1330 = vmatpush3.bf16.msra.mxu0 %v1500_v8  ;;  %v1541_v27 = vsub.s32 0, %v1535_v25  ;;  %v1544_v28 = vsub.s32 1, %v1535_v25  ;;  %v398_v29 = vsub.s32 2, %v1535_v25  ;;  %v483_v30 = vsub.s32 3, %v1535_v25  ;;  %s1408_s27 = scalar_lea.vmem %s1133_s26, 256  ;;  %p1413_p1 = scmp.lt.s32.totalorder %s1133_s26, %s1133_s26 }
   0x9   :  { %1331 = vmatprep.subr.bf16.mxu0 %v1433_v9  ;;  %vm223_vm5 = vcmp.eq.s32.totalorder %v1535_v25, 0  ;;  %v568_v34 = vsub.s32 4, %v1535_v25  ;;  %v653_v35 = vsub.s32 5, %v1535_v25  ;;  %vm229_vm6 = vcmp.eq.s32.totalorder %v1535_v25, 1  ;;  %p1409_p0 = scmp.ne.s32.totalorder %s1133_s26, %s1408_s27  ;;  %p1414_p2 = scmp.lt.s32.totalorder %s1408_s27, %s1408_s27 }
   0xa   :  { %39 = vperm.xlu0 %1391, %v32_v5   ;;  %v738_v37 = vsub.s32 6, %v1535_v25  ;;  %v823_v38 = vsub.s32 7, %v1535_v25  ;;  %vm921_vm10 = vcmp.eq.s32.totalorder %v1535_v25, 2  ;;  %vm929_vm12 = vcmp.eq.s32.totalorder %v1535_v25, 3 }
   0xb   :  { %vm937_vm14 = vcmp.eq.s32.totalorder %v1535_v25, 4  ;;  %vm945_vm0 = vcmp.eq.s32.totalorder %v1535_v25, 5  ;;  %p1415_p3 = por %p1414_p2, %p1413_p1 }
   0xc   :  { %1333 = vmatpush3.bf16.msra.mxu0 %v1511_v12 }
   0xd   :  { %1340 = vmatprep.subr.bf16.mxu0 %v1433_v9  ;;  %p1416_p4 = pnand %p1415_p3, %p1409_p0 }
   0xf   :  { %1234 = vmatmul.mubr.f32.vlgmr.msra.gmra.mrb[0].mxu0 %v1435_v13 }
  0x10   :  { %1342 = vmatpush3.bf16.msra.mxu0 %v1500_v8  ;;  %1255 = vmatprep.mubr.msk.f32.mxu0 %vm1434_vm1, %v1435_v13 }
  0x11   :  { %1343 = vmatprep.subr.bf16.mxu0 %v1433_v9 }
  0x14   :  { %1345 = vmatpush3.bf16.msra.mxu0 %v1511_v12 }
  0x15   :  { %1352 = vmatprep.subr.bf16.mxu0 %v1433_v9 }
  0x85   :  { %v37_v16 = vpop.permute.xlu0 %36 }
  0x86   :  { %vm41_vm3 = vcmp.eq.s32.totalorder %v37_v16, %v34_v15 }
  0x87   :  { %v1143_v17 = vsel %vm41_vm3, 1.0, %v1435_v13 }
  0x88   :  { %1222 = vmatprep.mubr.msk.f32.mxu1 %vm139_vm2, %v1143_v17 }
  0x89   :  { %v40_v20 = vpop.permute.xlu0 %39 }
  0x8a   :  { %vm42_vm4 = vcmp.eq.s32.totalorder %v40_v20, %v34_v15 }
  0x8b   :  { %v1144_v22 = vsel %vm42_vm4, 1.0, %v1435_v13 }
  0xd8   :  { %v1217_v18 = vpop.f32.mrb[0].mxu1 }
  0xd9   :  { %v123_v19 = vpop.f32.mrb[1].mxu1 }
  0xda   :  { %v1324_v21 = vpack.c.bf16 %v1217_v18, %v123_v19  ;;  %v1611_v18 = vadd.s32 8, %v1535_v25 }
  0xdc   :  { %1325 = vmatprep.subr.bf16.mxu1 %v1324_v21  ;;  %vm970_vm8 = vcmp.eq.s32.totalorder %v1611_v18, 8  ;;  %vm978_vm9 = vcmp.eq.s32.totalorder %v1611_v18, 9  ;;  %vm986_vm11 = vcmp.eq.s32.totalorder %v1611_v18, 10  ;;  %vm994_vm13 = vcmp.eq.s32.totalorder %v1611_v18, 11 }
  0xdd   :  { %1327 = vmatpush3.bf16.msra.mxu1 %v1324_v21  ;;  %vm1002_vm15 = vcmp.eq.s32.totalorder %v1611_v18, 12  ;;  %vm1010_vm3 = vcmp.eq.s32.totalorder %v1611_v18, 13  ;;  %vm1018_vm4 = vcmp.eq.s32.totalorder %v1611_v18, 14 }
  0xde   :  { %1334 = vmatprep.subr.bf16.mxu1 %v1433_v9 }
  0xe0   :  { %1223 = vmatmul.mubr.msk.f32.vlgmr.msra.gmra.mrb[2].mxu1 %vm139_vm2, %v1144_v22 }
  0xe1   :  { %1336 = vmatpush3.bf16.msra.mxu1 %v1500_v8  ;;  %1244 = vmatprep.mubr.msk.f32.mxu1 %vm1434_vm1, %v1435_v13 }
  0xe2   :  { %1337 = vmatprep.subr.bf16.mxu1 %v1433_v9  ;;  %v305_v23 = vpop.f32.mrb[0].mxu0 }
  0xe3   :  { %v1235_v24 = vpop.f32.mrb[1].mxu0 }
  0xe5   :  { %1339 = vmatpush3.bf16.msra.mxu1 %v1511_v12 }
  0xe6   :  { %1346 = vmatprep.subr.bf16.mxu1 %v1433_v9 }
 0x1b3   :  { %v1224_v31 = vpop.f32.mrb[2].mxu1 }
 0x1b4   :  { %v218_v32 = vadd.f32 %v1224_v31, %v1147_v26  ;;  %v212_v33 = vpop.f32.mrb[3].mxu1 }
 0x1b5   :  { %v213_v36 = vadd.f32 %v1147_v26, %v212_v33 }
 0x1b6   :  { %v233_v39 = vrot.slane %v218_v32, %v1541_v27  ;;  %v319_v40 = vrot.slane %v218_v32, %v1544_v28  ;;  %v404_v41 = vrot.slane %v218_v32, %v398_v29  ;;  %v489_v42 = vrot.slane %v218_v32, %v483_v30 }
 0x1b7   :  { %v227_v43 = vrot.slane %v213_v36, %v1541_v27  ;;  %v314_v44 = vrot.slane %v213_v36, %v1544_v28  ;;  %v399_v45 = vrot.slane %v213_v36, %v398_v29  ;;  %v484_v46 = vrot.slane %v213_v36, %v483_v30 }
 0x1b8   :  { %v569_v47 = vrot.slane %v213_v36, %v568_v34  ;;  %v574_v48 = vrot.slane %v218_v32, %v568_v34  ;;  %v654_v49 = vrot.slane %v213_v36, %v653_v35  ;;  %v659_v50 = vrot.slane %v218_v32, %v653_v35 }
 0x1b9   :  { %v228_v51 = vsel %vm223_vm5, %v227_v43, 0.0  ;;  %v315_v52 = vsel %vm223_vm5, %v314_v44, 0.0  ;;  %v400_v53 = vsel %vm223_vm5, %v399_v45, 0.0  ;;  %v485_v54 = vsel %vm223_vm5, %v484_v46, 0.0 }
 0x1ba   :  { %v234_v55 = vsel %vm229_vm6, %v233_v39, %v228_v51  ;;  %v320_v56 = vsel %vm229_vm6, %v319_v40, %v315_v52  ;;  %v405_v57 = vsel %vm229_vm6, %v404_v41, %v400_v53  ;;  %v1574_v58 = vsel %vm229_vm6, %v489_v42, %v485_v54 }
 0x1bb   :  { %v309_v59 = vadd.f32 %v305_v23, %v234_v55  ;;  %v570_v60 = vsel %vm223_vm5, %v569_v47, 0.0  ;;  %v655_v61 = vsel %vm223_vm5, %v654_v49, 0.0  ;;  %v739_v62 = vrot.slane %v213_v36, %v738_v37 }
 0x1bc   :  { %v1582_v63 = vsel %vm229_vm6, %v574_v48, %v570_v60  ;;  %v1586_v0 = vsel %vm229_vm6, %v659_v50, %v655_v61  ;;  %v744_v1 = vrot.slane %v218_v32, %v738_v37  ;;  %v824_v2 = vrot.slane %v213_v36, %v823_v38 }
 0x1bd   :  { %1392 = vtanh.f32 %v309_v59  ;;  %v740_v3 = vsel %vm223_vm5, %v739_v62, 0.0  ;;  %v829_v4 = vrot.slane %v218_v32, %v823_v38 }
 0x1be   :  { %v1592_v5 = vsel %vm229_vm6, %v744_v1, %v740_v3  ;;  %v825_v6 = vsel %vm223_vm5, %v824_v2, 0.0  ;;  %v1033_v1 = vld [vmem:[%s1713_s5] sm:$0xff]  ;;  %v1034_v2 = vld [vmem:[%s1713_s5 + $0x8] sm:$0xff]  ;;  %v1035_v3 = vld [vmem:[%s1713_s5 + $0x10] sm:$0xff] }
 0x1bf   :  { %v1598_v7 = vsel %vm229_vm6, %v829_v4, %v825_v6  ;;  %v1376_v4 = vpack.c.bf16 %v1034_v2, %v1033_v1 }
 0x1c7   :  { %v1393_v10 = vpop.eup %1392 }
 0x1c8   :  { %1245 = vmatmul.mubr.msk.f32.vlgmr.msra.gmra.mrb[4].mxu1 %vm235_vm7, %v1393_v10  ;;  %v911_v11 = vrot.slane %v1393_v10, %v1541_v27  ;;  %v974_v19 = vrot.slane %v1393_v10, %v1544_v28 }
 0x1c9   :  { %1348 = vmatpush3.bf16.msra.mxu1 %v1500_v8  ;;  %1266 = vmatprep.mubr.msk.f32.mxu1 %vm1434_vm1, %v1435_v13 }
 0x1ca   :  { %1349 = vmatprep.subr.bf16.mxu1 %v1433_v9  ;;  %v912_v14 = vsel %vm223_vm5, %v911_v11, 0.0  ;;  %v976_v23 = vsel %vm970_vm8, %v974_v19, 0.0  ;;  %vm961_vm5 = vcmp.eq.s32.totalorder %v1535_v25, 7 }
 0x1cd   :  { %1351 = vmatpush3.bf16.msra.mxu1 %v1511_v12 }
 0x1ce   :  { %1358 = vmatprep.subr.bf16.mxu1 %v1433_v9 }
 0x29b   :  { %v390_v15 = vpop.f32.mrb[4].mxu1 }
 0x29c   :  { %v394_v16 = vadd.f32 %v390_v15, %v320_v56  ;;  %v1246_v17 = vpop.f32.mrb[5].mxu1 }
 0x29e   :  { %1394 = vtanh.f32 %v394_v16 }
 0x2a8   :  { %v1395_v20 = vpop.eup %1394 }
 0x2a9   :  { %1256 = vmatmul.mubr.msk.f32.vlgmr.msra.gmra.mrb[2].mxu0 %vm235_vm7, %v1395_v20  ;;  %v918_v21 = vrot.slane %v1395_v20, %v1541_v27  ;;  %v982_v22 = vrot.slane %v1395_v20, %v1544_v28 }
 0x2aa   :  { %1354 = vmatpush3.bf16.msra.mxu0 %v1500_v8  ;;  %1277 = vmatprep.mubr.msk.f32.mxu0 %vm1434_vm1, %v1435_v13 }
 0x2ab   :  { %1355 = vmatprep.subr.bf16.mxu0 %v1433_v9  ;;  %v919_v24 = vsel %vm229_vm6, %v918_v21, %v912_v14  ;;  %v984_v26 = vsel %vm978_vm9, %v982_v22, %v976_v23  ;;  %vm1026_vm6 = vcmp.eq.s32.totalorder %v1611_v18, 15 }
 0x2ae   :  { %1357 = vmatpush3.bf16.msra.mxu0 %v1511_v12 }
 0x2af   :  { %1364 = vmatprep.subr.bf16.mxu0 %v1433_v9 }
 0x37c   :  { %v475_v29 = vpop.f32.mrb[2].mxu0 }
 0x37d   :  { %v479_v30 = vadd.f32 %v475_v29, %v405_v57  ;;  %v1257_v31 = vpop.f32.mrb[3].mxu0 }
 0x37f   :  { %1396 = vtanh.f32 %v479_v30 }
 0x389   :  { %v1397_v32 = vpop.eup %1396 }
 0x38a   :  { %1267 = vmatmul.mubr.msk.f32.vlgmr.msra.gmra.mrb[6].mxu1 %vm235_vm7, %v1397_v32  ;;  %v926_v33 = vrot.slane %v1397_v32, %v1541_v27  ;;  %v990_v34 = vrot.slane %v1397_v32, %v1544_v28 }
 0x38b   :  { %1360 = vmatpush3.bf16.msra.mxu1 %v1500_v8  ;;  %1288 = vmatprep.mubr.msk.f32.mxu1 %vm1434_vm1, %v1435_v13 }
 0x38c   :  { %1361 = vmatprep.subr.bf16.mxu1 %v1433_v9  ;;  %v927_v35 = vsel %vm921_vm10, %v926_v33, %v919_v24  ;;  %v992_v36 = vsel %vm986_vm11, %v990_v34, %v984_v26 }
 0x38f   :  { %1363 = vmatpush3.bf16.msra.mxu1 %v1511_v12 }
 0x390   :  { %1370 = vmatprep.subr.bf16.mxu1 %v1433_v9 }
 0x45d   :  { %v560_v37 = vpop.f32.mrb[6].mxu1 }
 0x45e   :  { %v564_v38 = vadd.f32 %v560_v37, %v1574_v58  ;;  %v1268_v39 = vpop.f32.mrb[7].mxu1 }
 0x460   :  { %1398 = vtanh.f32 %v564_v38 }
 0x46a   :  { %v1399_v40 = vpop.eup %1398 }
 0x46b   :  { %1278 = vmatmul.mubr.msk.f32.vlgmr.msra.gmra.mrb[4].mxu0 %vm235_vm7, %v1399_v40  ;;  %v934_v41 = vrot.slane %v1399_v40, %v1541_v27  ;;  %v998_v42 = vrot.slane %v1399_v40, %v1544_v28 }
 0x46c   :  { %1366 = vmatpush3.bf16.msra.mxu0 %v1500_v8  ;;  %1299 = vmatprep.mubr.msk.f32.mxu0 %vm1434_vm1, %v1435_v13 }
 0x46d   :  { %1367 = vmatprep.subr.bf16.mxu0 %v1433_v9  ;;  %v935_v43 = vsel %vm929_vm12, %v934_v41, %v927_v35  ;;  %v1000_v44 = vsel %vm994_vm13, %v998_v42, %v992_v36 }
 0x470   :  { %1369 = vmatpush3.bf16.msra.mxu0 %v1511_v12 }
 0x471   :  { %1377 = vmatprep.subr.bf16.mxu0 %v1376_v4 }
 0x53e   :  { %v645_v45 = vpop.f32.mrb[4].mxu0 }
 0x53f   :  { %v649_v46 = vadd.f32 %v645_v45, %v1582_v63  ;;  %v1279_v47 = vpop.f32.mrb[5].mxu0 }
 0x541   :  { %1400 = vtanh.f32 %v649_v46 }
 0x54b   :  { %v1401_v48 = vpop.eup %1400 }
 0x54c   :  { %1289 = vmatmul.mubr.msk.f32.vlgmr.msra.gmra.mrb[8].mxu1 %vm235_vm7, %v1401_v48  ;;  %v942_v49 = vrot.slane %v1401_v48, %v1541_v27  ;;  %v1006_v50 = vrot.slane %v1401_v48, %v1544_v28 }
 0x54d   :  { %1372 = vmatpush3.bf16.msra.mxu1 %v1500_v8  ;;  %1310 = vmatprep.mubr.msk.f32.mxu1 %vm1434_vm1, %v1435_v13  ;;  %vm953_vm1 = vcmp.eq.s32.totalorder %v1535_v25, 6 }
 0x54e   :  { %1373 = vmatprep.subr.bf16.mxu1 %v1433_v9  ;;  %v943_v51 = vsel %vm937_vm14, %v942_v49, %v935_v43  ;;  %v1008_v52 = vsel %vm1002_vm15, %v1006_v50, %v1000_v44 }
 0x551   :  { %1375 = vmatpush3.bf16.msra.mxu1 %v1511_v12 }
 0x61f   :  { %v730_v53 = vpop.f32.mrb[8].mxu1 }
 0x620   :  { %v734_v54 = vadd.f32 %v730_v53, %v1586_v0  ;;  %v1290_v55 = vpop.f32.mrb[9].mxu1 }
 0x622   :  { %1402 = vtanh.f32 %v734_v54 }
 0x62c   :  { %v1403_v56 = vpop.eup %1402 }
 0x62d   :  { %1300 = vmatmul.mubr.msk.f32.vlgmr.msra.gmra.mrb[6].mxu0 %vm235_vm7, %v1403_v56  ;;  %v950_v8 = vrot.slane %v1403_v56, %v1541_v27  ;;  %v1014_v9 = vrot.slane %v1403_v56, %v1544_v28 }
 0x62e   :  { %1379 = vmatpush3.bf16.msra.mxu0 %v1376_v4 }
 0x62f   :  { %v951_v13 = vsel %vm945_vm0, %v950_v8, %v943_v51  ;;  %v1016_v57 = vsel %vm1010_vm3, %v1014_v9, %v1008_v52 }
 0x700   :  { %v815_v58 = vpop.f32.mrb[6].mxu0 }
 0x701   :  { %v819_v12 = vadd.f32 %v815_v58, %v1592_v5  ;;  %v1301_v59 = vpop.f32.mrb[7].mxu0  ;;  %v1036_v5 = vld [vmem:[%s1713_s5 + $0x18] sm:$0xff] }
 0x702   :  { %v1380_v6 = vpack.c.bf16 %v1036_v5, %v1035_v3 }
 0x703   :  { %1404 = vtanh.f32 %v819_v12 }
 0x704   :  { %1381 = vmatprep.subr.bf16.mxu0 %v1380_v6 }
 0x705   :  { %1383 = vmatpush3.bf16.msra.mxu0 %v1380_v6 }
 0x70d   :  { %v1405_v60 = vpop.eup %1404 }
 0x70e   :  { %1311 = vmatmul.mubr.msk.f32.vlgmr.msra.gmra.mrb[10].mxu1 %vm235_vm7, %v1405_v60  ;;  %v958_v61 = vrot.slane %v1405_v60, %v1541_v27  ;;  %v1022_v62 = vrot.slane %v1405_v60, %v1544_v28 }
 0x710   :  { %v959_v63 = vsel %vm953_vm1, %v958_v61, %v951_v13  ;;  %v1024_v0 = vsel %vm1018_vm4, %v1022_v62, %v1016_v57 }
 0x7e1   :  { %v900_v10 = vpop.f32.mrb[10].mxu1 }
 0x7e2   :  { %v904_v11 = vadd.f32 %v900_v10, %v1598_v7  ;;  %v1312_v14 = vpop.f32.mrb[11].mxu1  ;;  %v1157_v7 = vld [vmem:[%s1714_s6] ss:$0 sm:$0xff] }
 0x7e4   :  { %1406 = vtanh.f32 %v904_v11 }
 0x7ee   :  { %v1407_v15 = vpop.eup %1406 }
 0x7ef   :  { %v966_v16 = vrot.slane %v1407_v15, %v1541_v27  ;;  %v1030_v17 = vrot.slane %v1407_v15, %v1544_v28 }
 0x7f1   :  { %v967_v19 = vsel %vm961_vm5, %v966_v16, %v959_v63  ;;  %v1032_v20 = vsel %vm1026_vm6, %v1030_v17, %v1024_v0 }
 0x7f2   :  { %1321 = vmatprep.mubr.msk.f32.mxu0 %vm235_vm7, %v967_v19 }
 0x7f3   :  { %1322 = vmatmul.mubr.msk.f32.vlgmr.msra.gmra.mrb[8].mxu0 %vm235_vm7, %v1032_v20 }
 0x8c6   :  { %v1323_v21 = vpop.f32.mrb[8].mxu0 }
 0x8c7   :  { %v1122_v25 = vadd.f32 %v1323_v21, %v1157_v7  ;;  %v1116_v22 = vpop.f32.mrb[9].mxu0 }
 0x8c8   :  { %v1117_v18 = vadd.f32 %v1157_v7, %v1116_v22 }
 0x8c9   :  { %1126 = vst.msk [vmem:[#allocation2 + $0x8] sm:$0xff] %vm139_vm2, %v1122_v25 }
 0x8ca   :  { %1125 = vst.msk [vmem:[#allocation2] sm:$0xff] %vm139_vm2, %v1117_v18 }
 0x8cb   :  { %1419 = shalt.err (!%p1416_p4)
}
 0x8cc   :  { %s1420_s29 = scalar_lea.hbm %s1715_s7, 256 }
 0x8cd   :  { %p1421_p5 = scmp.ne.s32.totalorder %s1715_s7, %s1420_s29  ;;  %p1424_p6 = scmp.lt.u32.totalorder %s1420_s29, %s1715_s7 }
 0x8cf   :  { %p1426_p7 = pnand %p1424_p6, %p1421_p5 }
 0x8d1   :  { %1429 = shalt.err (!%p1426_p7)
}
 0x8d2   :  { %s1437_s10 = smov 128   ;;  %s1438_s11 = smov 8  }
 0x8d3   :  { %1138 = dma.vmem_to_hbm [thread:$0]  %s1133_s26, 256, %s1715_s7, [#allocation3], %s1437_s10, %s1437_s10, %s1438_s11  }
 0x8d4   :  { %1430 = dma.done.wait [#allocation3], 256  }
 0x8d5   :  { %1431 = vsyncadd [#allocation3], 4294967040 }
 0x8d6   :  { %1142 = vsyncpa [#allocation3], 1 }

</bundles_post_ra>
